<compile_context>
chip_gen: v7x
topology: tpu7x:2x2x1
jax: 0.10.0
libtpu: 0.0.40
codegen_flags: <defaults>
</compile_context>

<pallas_src>
import functools

import jax
import jax.numpy as jnp
from jax import lax
from jax.experimental import pallas as pl
from jax.experimental.pallas import tpu as pltpu


# ---------------------------------------------------------------------------
# Fused whole-forward kernel
# ---------------------------------------------------------------------------
def _silu(x):
    # Exact SiLU (kept f32-exact to meet the 1e-4 check; the divide could move
    # to the EUP via pl.reciprocal(..., approx=True) at relaxed tolerance).
    return x * (1.0 / (1.0 + jnp.exp(-x)))


def _fused_kernel(x_ref, m_ref,
                  hw13_ref, hb13_ref, hw2_ref, hb2_ref,
                  dw13_ref, db13_ref, dw2_ref, db2_ref,
                  sw13_ref, sb13_ref, sw2_ref, sb2_ref,
                  out_ref, *, step, seq_len):
    nl = x_ref.shape[1]

    # Edge masks along the folded (N*L) lane axis: zero the +/-1 taps at the
    # first/last position of every sample (also kills the roll wraparound).
    col = lax.broadcasted_iota(jnp.int32, (1, nl), 1) % seq_len
    keep_l = (col != 0).astype(jnp.float32)
    keep_r = (col != seq_len - 1).astype(jnp.float32)

    def taps(h):
        """(C, NL) -> (3C, NL): rows = [h[l-1]; h[l]; h[l+1]], zero 'same' pad."""
        hp = pltpu.roll(h, shift=1, axis=1) * keep_l        # h[l-1]
        hn = pltpu.roll(h, shift=nl - 1, axis=1) * keep_r   # h[l+1]
        return jnp.concatenate([hp, h, hn], axis=0)         # 8-row aligned stacks

    def block(h, w13, b13, w2, b2):
        cout = w2.shape[0]
        # conv1 + conv3 fused into one MXU matmul (2*Cout rows, K = 3*Cin).
        y13 = jnp.dot(w13, taps(h), preferred_element_type=jnp.float32) + b13
        a = _silu(y13[:cout, :])                             # SiLU(conv1(x))
        res = y13[cout:, :]                                  # conv3(x) residual
        y2 = jnp.dot(w2, taps(a), preferred_element_type=jnp.float32) + b2
        return _silu(y2) + res

    # Hoist weight loads out of the unrolled step chain.
    hw = (hw13_ref[...], hb13_ref[...], hw2_ref[...], hb2_ref[...])
    dw = (dw13_ref[...], db13_ref[...], dw2_ref[...], db2_ref[...])
    sw = (sw13_ref[...], sb13_ref[...], sw2_ref[...], sb2_ref[...])

    x = x_ref[...] * m_ref[...]          # L63_DARNN's `xinp * mask`, fused
    x = block(x, *hw)                    # model_head
    x = block(x, *dw)                    # model_dyn
    out_ref[0] = x.astype(out_ref.dtype)
    for s in range(step):                # static unroll (step is small & static)
        x = block(x, *sw)                # model_sup
        x = block(x, *dw)                # model_dyn
        out_ref[s + 1] = x.astype(out_ref.dtype)


# ---------------------------------------------------------------------------
# Wrapper
# ---------------------------------------------------------------------------
def _taps_weight(w):
    """torch Conv1d weight (Cout, Cin, 3) -> (Cout, 3*Cin) matching the tap stack."""
    cout, cin, k = w.shape
    return jnp.transpose(w, (0, 2, 1)).reshape(cout, k * cin)


def _pack_block(params, cin_pad):
    """Pack one Block's 3 convs into (w13, b13, w2, b2); pad Cin to `cin_pad`."""
    w1, b1, w2, b2, w3, b3 = params

    def pad_cin(w):
        cin = w.shape[1]
        if cin < cin_pad:
            w = jnp.pad(w, ((0, 0), (0, cin_pad - cin), (0, 0)))
        return w

    w13 = jnp.concatenate([_taps_weight(pad_cin(w1)),
                           _taps_weight(pad_cin(w3))], axis=0)   # (2Co, 3*cin_pad)
    b13 = jnp.concatenate([b1, b3])[:, None]                     # (2Co, 1)
    w2c = _taps_weight(w2)                                       # (Co, 3Co)
    b2c = b2[:, None]                                            # (Co, 1)
    return w13, b13, w2c, b2c


@functools.partial(jax.jit, static_argnames=("step",))
def l63_darnn_forward(xinp, mask, head_params, dyn_params, sup_params, step):
    """L63_DARNN.forward with each sub-model realised as one conv Block.

    xinp, mask: (N, Cin, L) f32 (PyTorch NCL). Returns list of step+1 arrays
    of shape (N, Cout, L).
    """
    n, cin, length = xinp.shape
    hid = dyn_params[0].shape[0]
    assert hid % 8 == 0, "hidden channels must be a multiple of 8 (sublane tile)"
    cin_pad = ((cin + 7) // 8) * 8
    nl = n * length

    # Lane-dense layout: (N, Cin, L) -> (Cin, N*L), channels padded to 8 rows.
    def to_lane(a):
        a = jnp.transpose(a, (1, 0, 2)).reshape(cin, nl)
        return jnp.pad(a, ((0, cin_pad - cin), (0, 0)))

    x_cl = to_lane(xinp)
    m_cl = to_lane(mask)

    # Weight packing happens once per jit trace (hoisted out of the step chain).
    hp = _pack_block(head_params, cin_pad)
    dp = _pack_block(dyn_params, hid)
    sp = _pack_block(sup_params, hid) if sup_params is not None else dp

    vmem = pl.BlockSpec(memory_space=pltpu.MemorySpace.VMEM)
    out = pl.pallas_call(
        functools.partial(_fused_kernel, step=step, seq_len=length),
        out_shape=jax.ShapeDtypeStruct((step + 1, hid, nl), jnp.float32),
        in_specs=[vmem] * 14,
        out_specs=vmem,
    )(x_cl, m_cl, *hp, *dp, *sp)

    # Back to PyTorch NCL: (step+1, C, N*L) -> list of (N, C, L).
    out = out.reshape(step + 1, hid, n, length).transpose(0, 2, 1, 3)
    return [out[s] for s in range(step + 1)]


# ---------------------------------------------------------------------------
# Pure-JAX reference (for correctness check)
# ---------------------------------------------------------------------------
def _conv1d_ref(x_ncl, w_oik, b):
    y = lax.conv_general_dilated(
        x_ncl, w_oik, window_strides=(1,), padding=[(1, 1)],
        dimension_numbers=("NCH", "OIH", "NCH"))
    return y + b[None, :, None]


def _block_ref(x_ncl, params):
    w1, b1, w2, b2, w3, b3 = params
    h = jax.nn.silu(_conv1d_ref(x_ncl, w1, b1))
    h = jax.nn.silu(_conv1d_ref(h, w2, b2))
    return h + _conv1d_ref(x_ncl, w3, b3)


def _l63_darnn_ref(xinp, mask, head_params, dyn_params, sup_params, step):
    outputs = []
    x = _block_ref(xinp * mask, head_params)
    x = _block_ref(x, dyn_params)
    outputs.append(x)
    for _ in range(step):
        x = _block_ref(x, sup_params)
        x = _block_ref(x, dyn_params)
        outputs.append(x)
    return outputs


def _init_conv(key, in_ch, out_ch):
    kw, kb = jax.random.split(key)
    bound = 1.0 / jnp.sqrt(in_ch * 3.0)
    w = jax.random.uniform(kw, (out_ch, in_ch, 3), jnp.float32, -bound, bound)
    b = jax.random.uniform(kb, (out_ch,), jnp.float32, -bound, bound)
    return w, b


def _init_block(key, in_ch, out_ch):
    k1, k2, k3 = jax.random.split(key, 3)
    w1, b1 = _init_conv(k1, in_ch, out_ch)    # conv1: in_ch  -> out_ch
    w2, b2 = _init_conv(k2, out_ch, out_ch)   # conv2: out_ch -> out_ch
    w3, b3 = _init_conv(k3, in_ch, out_ch)    # conv3: in_ch  -> out_ch (residual)
    return (w1, b1, w2, b2, w3, b3)


if __name__ == "__main__":
    # N*L = 128 -> exactly one lane-tile width inside the kernel.
    N, IN_CH, HID_CH, L, STEP = 8, 4, 8, 16, 2

    key = jax.random.PRNGKey(0)
    kx, km, kh, kd, ks = jax.random.split(key, 5)

    xinp = jax.random.normal(kx, (N, IN_CH, L), jnp.float32)
    mask = (jax.random.uniform(km, (N, IN_CH, L)) > 0.3).astype(jnp.float32)

    head_params = _init_block(kh, IN_CH, HID_CH)   # model_head: in_ch -> hid
    dyn_params = _init_block(kd, HID_CH, HID_CH)   # model_dyn : hid   -> hid
    sup_params = _init_block(ks, HID_CH, HID_CH)   # model_sup : hid   -> hid

    outs = l63_darnn_forward(xinp, mask, head_params, dyn_params, sup_params,
                             step=STEP)
    outs = jax.block_until_ready(outs)

    refs = _l63_darnn_ref(xinp, mask, head_params, dyn_params, sup_params, STEP)
    refs = jax.block_until_ready(refs)

    assert len(outs) == STEP + 1, len(outs)
    for o, r in zip(outs, refs):
        assert o.shape == (N, HID_CH, L), o.shape
        max_err = float(jnp.max(jnp.abs(o - r)))
        assert jnp.allclose(o, r, atol=1e-4, rtol=1e-4), max_err

    print("KERNEL_OK")
</pallas_src>

<mosaic_0001>
module attributes {stable_mosaic.version = 11 : i64} {
  func.func @_fused_kernel(%arg0: memref<8x128xf32, #tpu.memory_space<vmem>>, %arg1: memref<8x128xf32, #tpu.memory_space<vmem>>, %arg2: memref<16x24xf32, #tpu.memory_space<vmem>>, %arg3: memref<16x1xf32, #tpu.memory_space<vmem>>, %arg4: memref<8x24xf32, #tpu.memory_space<vmem>>, %arg5: memref<8x1xf32, #tpu.memory_space<vmem>>, %arg6: memref<16x24xf32, #tpu.memory_space<vmem>>, %arg7: memref<16x1xf32, #tpu.memory_space<vmem>>, %arg8: memref<8x24xf32, #tpu.memory_space<vmem>>, %arg9: memref<8x1xf32, #tpu.memory_space<vmem>>, %arg10: memref<16x24xf32, #tpu.memory_space<vmem>>, %arg11: memref<16x1xf32, #tpu.memory_space<vmem>>, %arg12: memref<8x24xf32, #tpu.memory_space<vmem>>, %arg13: memref<8x1xf32, #tpu.memory_space<vmem>>, %arg14: memref<3x8x128xf32, #tpu.memory_space<vmem>>) attributes {dimension_semantics = [], scalar_prefetch = 0 : i64, scratch_operands = 0 : i64, tpu.core_type = #tpu.core_type<tc>} {
    %0 = tpu.iota {dimensions = array<i32: 1>} : vector<1x128xi32>
    %c16_i32 = arith.constant 16 : i32
    %c0_i32 = arith.constant 0 : i32
    %1 = arith.cmpi eq, %c16_i32, %c0_i32 : i32
    %c1_i32 = arith.constant 1 : i32
    %2 = arith.select %1, %c1_i32, %c16_i32 : i32
    %3 = vector.broadcast %2 : i32 to vector<1x128xi32>
    %4 = arith.remsi %0, %3 : vector<1x128xi32>
    %c0_i32_0 = arith.constant 0 : i32
    %5 = vector.broadcast %c0_i32_0 : i32 to vector<1x128xi32>
    %6 = arith.cmpi ne, %4, %5 : vector<1x128xi32>
    %c0_i32_1 = arith.constant 0 : i32
    %7 = vector.broadcast %c0_i32_1 : i32 to vector<1x128xi32>
    %8 = arith.cmpi slt, %4, %7 : vector<1x128xi32>
    %c0_i32_2 = arith.constant 0 : i32
    %9 = arith.cmpi slt, %2, %c0_i32_2 : i32
    %10 = vector.broadcast %9 : i1 to vector<1x128xi1>
    %11 = vector.broadcast %10 : vector<1x128xi1> to vector<1x128xi1>
    %12 = arith.xori %8, %11 : vector<1x128xi1>
    %13 = arith.andi %12, %6 : vector<1x128xi1>
    %14 = vector.broadcast %2 : i32 to vector<1x128xi32>
    %15 = arith.addi %4, %14 : vector<1x128xi32>
    %16 = arith.select %13, %15, %4 : vector<1x128xi1>, vector<1x128xi32>
    %c0_i32_3 = arith.constant 0 : i32
    %17 = vector.broadcast %c0_i32_3 : i32 to vector<1x128xi32>
    %18 = arith.cmpi ne, %16, %17 : vector<1x128xi32>
    %19 = arith.extui %18 : vector<1x128xi1> to vector<1x128xi32>
    %20 = arith.sitofp %19 : vector<1x128xi32> to vector<1x128xf32>
    %c15_i32 = arith.constant 15 : i32
    %21 = vector.broadcast %c15_i32 : i32 to vector<1x128xi32>
    %22 = arith.cmpi ne, %16, %21 : vector<1x128xi32>
    %23 = arith.extui %22 : vector<1x128xi1> to vector<1x128xi32>
    %24 = arith.sitofp %23 : vector<1x128xi32> to vector<1x128xf32>
    %c0 = arith.constant 0 : index
    %c0_4 = arith.constant 0 : index
    %25 = vector.load %arg2[%c0, %c0_4] : memref<16x24xf32, #tpu.memory_space<vmem>>, vector<16x24xf32>
    %c0_5 = arith.constant 0 : index
    %c0_6 = arith.constant 0 : index
    %26 = vector.load %arg3[%c0_5, %c0_6] : memref<16x1xf32, #tpu.memory_space<vmem>>, vector<16x1xf32>
    %c0_7 = arith.constant 0 : index
    %c0_8 = arith.constant 0 : index
    %27 = vector.load %arg4[%c0_7, %c0_8] : memref<8x24xf32, #tpu.memory_space<vmem>>, vector<8x24xf32>
    %c0_9 = arith.constant 0 : index
    %c0_10 = arith.constant 0 : index
    %28 = vector.load %arg5[%c0_9, %c0_10] : memref<8x1xf32, #tpu.memory_space<vmem>>, vector<8x1xf32>
    %c0_11 = arith.constant 0 : index
    %c0_12 = arith.constant 0 : index
    %29 = vector.load %arg6[%c0_11, %c0_12] : memref<16x24xf32, #tpu.memory_space<vmem>>, vector<16x24xf32>
    %c0_13 = arith.constant 0 : index
    %c0_14 = arith.constant 0 : index
    %30 = vector.load %arg7[%c0_13, %c0_14] : memref<16x1xf32, #tpu.memory_space<vmem>>, vector<16x1xf32>
    %c0_15 = arith.constant 0 : index
    %c0_16 = arith.constant 0 : index
    %31 = vector.load %arg8[%c0_15, %c0_16] : memref<8x24xf32, #tpu.memory_space<vmem>>, vector<8x24xf32>
    %c0_17 = arith.constant 0 : index
    %c0_18 = arith.constant 0 : index
    %32 = vector.load %arg9[%c0_17, %c0_18] : memref<8x1xf32, #tpu.memory_space<vmem>>, vector<8x1xf32>
    %c0_19 = arith.constant 0 : index
    %c0_20 = arith.constant 0 : index
    %33 = vector.load %arg10[%c0_19, %c0_20] : memref<16x24xf32, #tpu.memory_space<vmem>>, vector<16x24xf32>
    %c0_21 = arith.constant 0 : index
    %c0_22 = arith.constant 0 : index
    %34 = vector.load %arg11[%c0_21, %c0_22] : memref<16x1xf32, #tpu.memory_space<vmem>>, vector<16x1xf32>
    %c0_23 = arith.constant 0 : index
    %c0_24 = arith.constant 0 : index
    %35 = vector.load %arg12[%c0_23, %c0_24] : memref<8x24xf32, #tpu.memory_space<vmem>>, vector<8x24xf32>
    %c0_25 = arith.constant 0 : index
    %c0_26 = arith.constant 0 : index
    %36 = vector.load %arg13[%c0_25, %c0_26] : memref<8x1xf32, #tpu.memory_space<vmem>>, vector<8x1xf32>
    %c0_27 = arith.constant 0 : index
    %c0_28 = arith.constant 0 : index
    %37 = vector.load %arg0[%c0_27, %c0_28] : memref<8x128xf32, #tpu.memory_space<vmem>>, vector<8x128xf32>
    %c0_29 = arith.constant 0 : index
    %c0_30 = arith.constant 0 : index
    %38 = vector.load %arg1[%c0_29, %c0_30] : memref<8x128xf32, #tpu.memory_space<vmem>>, vector<8x128xf32>
    %39 = arith.mulf %37, %38 : vector<8x128xf32>
    %c1_i32_31 = arith.constant 1 : i32
    %40 = tpu.dynamic_rotate %39 by %c1_i32_31 dim 1 : vector<8x128xf32>, i32 -> vector<8x128xf32>
    %41 = vector.broadcast %20 : vector<1x128xf32> to vector<8x128xf32>
    %42 = arith.mulf %40, %41 : vector<8x128xf32>
    %c127_i32 = arith.constant 127 : i32
    %43 = tpu.dynamic_rotate %39 by %c127_i32 dim 1 : vector<8x128xf32>, i32 -> vector<8x128xf32>
    %44 = vector.broadcast %24 : vector<1x128xf32> to vector<8x128xf32>
    %45 = arith.mulf %43, %44 : vector<8x128xf32>
    %46 = tpu.concatenate %42, %39, %45 in 0 : vector<8x128xf32>, vector<8x128xf32>, vector<8x128xf32> -> vector<24x128xf32>
    %cst = arith.constant dense<0.000000e+00> : vector<16x128xf32>
    %47 = tpu.matmul %25, %46, %cst {dimension_numbers = #tpu.dot_dimension_numbers<[1], [0], [0], [1], [0, 0, 1, 1], [], []>} : vector<16x24xf32>, vector<24x128xf32>, vector<16x128xf32> -> vector<16x128xf32>
    %48 = vector.broadcast %26 : vector<16x1xf32> to vector<16x128xf32>
    %49 = arith.addf %47, %48 : vector<16x128xf32>
    %50 = vector.extract_strided_slice %49 {offsets = [0, 0], sizes = [8, 128], strides = [1, 1]} : vector<16x128xf32> to vector<8x128xf32>
    %cst_32 = arith.constant 0.000000e+00 : f32
    %51 = vector.broadcast %cst_32 : f32 to vector<8x128xf32>
    %52 = arith.subf %51, %50 : vector<8x128xf32>
    %53 = math.exp %52 : vector<8x128xf32>
    %cst_33 = arith.constant 1.000000e+00 : f32
    %54 = vector.broadcast %cst_33 : f32 to vector<8x128xf32>
    %55 = arith.addf %54, %53 : vector<8x128xf32>
    %cst_34 = arith.constant 1.000000e+00 : f32
    %56 = vector.broadcast %cst_34 : f32 to vector<8x128xf32>
    %57 = arith.divf %56, %55 : vector<8x128xf32>
    %58 = arith.mulf %50, %57 : vector<8x128xf32>
    %59 = vector.extract_strided_slice %49 {offsets = [8, 0], sizes = [8, 128], strides = [1, 1]} : vector<16x128xf32> to vector<8x128xf32>
    %c1_i32_35 = arith.constant 1 : i32
    %60 = tpu.dynamic_rotate %58 by %c1_i32_35 dim 1 : vector<8x128xf32>, i32 -> vector<8x128xf32>
    %61 = vector.broadcast %20 : vector<1x128xf32> to vector<8x128xf32>
    %62 = arith.mulf %60, %61 : vector<8x128xf32>
    %c127_i32_36 = arith.constant 127 : i32
    %63 = tpu.dynamic_rotate %58 by %c127_i32_36 dim 1 : vector<8x128xf32>, i32 -> vector<8x128xf32>
    %64 = vector.broadcast %24 : vector<1x128xf32> to vector<8x128xf32>
    %65 = arith.mulf %63, %64 : vector<8x128xf32>
    %66 = tpu.concatenate %62, %58, %65 in 0 : vector<8x128xf32>, vector<8x128xf32>, vector<8x128xf32> -> vector<24x128xf32>
    %cst_37 = arith.constant dense<0.000000e+00> : vector<8x128xf32>
    %67 = tpu.matmul %27, %66, %cst_37 {dimension_numbers = #tpu.dot_dimension_numbers<[1], [0], [0], [1], [0, 0, 1, 1], [], []>} : vector<8x24xf32>, vector<24x128xf32>, vector<8x128xf32> -> vector<8x128xf32>
    %68 = vector.broadcast %28 : vector<8x1xf32> to vector<8x128xf32>
    %69 = arith.addf %67, %68 : vector<8x128xf32>
    %cst_38 = arith.constant 0.000000e+00 : f32
    %70 = vector.broadcast %cst_38 : f32 to vector<8x128xf32>
    %71 = arith.subf %70, %69 : vector<8x128xf32>
    %72 = math.exp %71 : vector<8x128xf32>
    %cst_39 = arith.constant 1.000000e+00 : f32
    %73 = vector.broadcast %cst_39 : f32 to vector<8x128xf32>
    %74 = arith.addf %73, %72 : vector<8x128xf32>
    %cst_40 = arith.constant 1.000000e+00 : f32
    %75 = vector.broadcast %cst_40 : f32 to vector<8x128xf32>
    %76 = arith.divf %75, %74 : vector<8x128xf32>
    %77 = arith.mulf %69, %76 : vector<8x128xf32>
    %78 = arith.addf %77, %59 : vector<8x128xf32>
    %c1_i32_41 = arith.constant 1 : i32
    %79 = tpu.dynamic_rotate %78 by %c1_i32_41 dim 1 : vector<8x128xf32>, i32 -> vector<8x128xf32>
    %80 = vector.broadcast %20 : vector<1x128xf32> to vector<8x128xf32>
    %81 = arith.mulf %79, %80 : vector<8x128xf32>
    %c127_i32_42 = arith.constant 127 : i32
    %82 = tpu.dynamic_rotate %78 by %c127_i32_42 dim 1 : vector<8x128xf32>, i32 -> vector<8x128xf32>
    %83 = vector.broadcast %24 : vector<1x128xf32> to vector<8x128xf32>
    %84 = arith.mulf %82, %83 : vector<8x128xf32>
    %85 = tpu.concatenate %81, %78, %84 in 0 : vector<8x128xf32>, vector<8x128xf32>, vector<8x128xf32> -> vector<24x128xf32>
    %cst_43 = arith.constant dense<0.000000e+00> : vector<16x128xf32>
    %86 = tpu.matmul %29, %85, %cst_43 {dimension_numbers = #tpu.dot_dimension_numbers<[1], [0], [0], [1], [0, 0, 1, 1], [], []>} : vector<16x24xf32>, vector<24x128xf32>, vector<16x128xf32> -> vector<16x128xf32>
    %87 = vector.broadcast %30 : vector<16x1xf32> to vector<16x128xf32>
    %88 = arith.addf %86, %87 : vector<16x128xf32>
    %89 = vector.extract_strided_slice %88 {offsets = [0, 0], sizes = [8, 128], strides = [1, 1]} : vector<16x128xf32> to vector<8x128xf32>
    %cst_44 = arith.constant 0.000000e+00 : f32
    %90 = vector.broadcast %cst_44 : f32 to vector<8x128xf32>
    %91 = arith.subf %90, %89 : vector<8x128xf32>
    %92 = math.exp %91 : vector<8x128xf32>
    %cst_45 = arith.constant 1.000000e+00 : f32
    %93 = vector.broadcast %cst_45 : f32 to vector<8x128xf32>
    %94 = arith.addf %93, %92 : vector<8x128xf32>
    %cst_46 = arith.constant 1.000000e+00 : f32
    %95 = vector.broadcast %cst_46 : f32 to vector<8x128xf32>
    %96 = arith.divf %95, %94 : vector<8x128xf32>
    %97 = arith.mulf %89, %96 : vector<8x128xf32>
    %98 = vector.extract_strided_slice %88 {offsets = [8, 0], sizes = [8, 128], strides = [1, 1]} : vector<16x128xf32> to vector<8x128xf32>
    %c1_i32_47 = arith.constant 1 : i32
    %99 = tpu.dynamic_rotate %97 by %c1_i32_47 dim 1 : vector<8x128xf32>, i32 -> vector<8x128xf32>
    %100 = vector.broadcast %20 : vector<1x128xf32> to vector<8x128xf32>
    %101 = arith.mulf %99, %100 : vector<8x128xf32>
    %c127_i32_48 = arith.constant 127 : i32
    %102 = tpu.dynamic_rotate %97 by %c127_i32_48 dim 1 : vector<8x128xf32>, i32 -> vector<8x128xf32>
    %103 = vector.broadcast %24 : vector<1x128xf32> to vector<8x128xf32>
    %104 = arith.mulf %102, %103 : vector<8x128xf32>
    %105 = tpu.concatenate %101, %97, %104 in 0 : vector<8x128xf32>, vector<8x128xf32>, vector<8x128xf32> -> vector<24x128xf32>
    %cst_49 = arith.constant dense<0.000000e+00> : vector<8x128xf32>
    %106 = tpu.matmul %31, %105, %cst_49 {dimension_numbers = #tpu.dot_dimension_numbers<[1], [0], [0], [1], [0, 0, 1, 1], [], []>} : vector<8x24xf32>, vector<24x128xf32>, vector<8x128xf32> -> vector<8x128xf32>
    %107 = vector.broadcast %32 : vector<8x1xf32> to vector<8x128xf32>
    %108 = arith.addf %106, %107 : vector<8x128xf32>
    %cst_50 = arith.constant 0.000000e+00 : f32
    %109 = vector.broadcast %cst_50 : f32 to vector<8x128xf32>
    %110 = arith.subf %109, %108 : vector<8x128xf32>
    %111 = math.exp %110 : vector<8x128xf32>
    %cst_51 = arith.constant 1.000000e+00 : f32
    %112 = vector.broadcast %cst_51 : f32 to vector<8x128xf32>
    %113 = arith.addf %112, %111 : vector<8x128xf32>
    %cst_52 = arith.constant 1.000000e+00 : f32
    %114 = vector.broadcast %cst_52 : f32 to vector<8x128xf32>
    %115 = arith.divf %114, %113 : vector<8x128xf32>
    %116 = arith.mulf %108, %115 : vector<8x128xf32>
    %117 = arith.addf %116, %98 : vector<8x128xf32>
    %c0_53 = arith.constant 0 : index
    %c0_54 = arith.constant 0 : index
    %c0_55 = arith.constant 0 : index
    %118 = vector.load %arg14[%c0_53, %c0_54, %c0_55] : memref<3x8x128xf32, #tpu.memory_space<vmem>>, vector<1x8x128xf32>
    %119 = vector.shape_cast %118 : vector<1x8x128xf32> to vector<8x128xf32>
    %120 = vector.shape_cast %117 : vector<8x128xf32> to vector<1x8x128xf32>
    tpu.vector_store %arg14[%c0_53, %c0_54, %c0_55], %120 {strides = array<i32>} : memref<3x8x128xf32, #tpu.memory_space<vmem>>, vector<1x8x128xf32>,
    %c1_i32_56 = arith.constant 1 : i32
    %121 = tpu.dynamic_rotate %117 by %c1_i32_56 dim 1 : vector<8x128xf32>, i32 -> vector<8x128xf32>
    %122 = vector.broadcast %20 : vector<1x128xf32> to vector<8x128xf32>
    %123 = arith.mulf %121, %122 : vector<8x128xf32>
    %c127_i32_57 = arith.constant 127 : i32
    %124 = tpu.dynamic_rotate %117 by %c127_i32_57 dim 1 : vector<8x128xf32>, i32 -> vector<8x128xf32>
    %125 = vector.broadcast %24 : vector<1x128xf32> to vector<8x128xf32>
    %126 = arith.mulf %124, %125 : vector<8x128xf32>
    %127 = tpu.concatenate %123, %117, %126 in 0 : vector<8x128xf32>, vector<8x128xf32>, vector<8x128xf32> -> vector<24x128xf32>
    %cst_58 = arith.constant dense<0.000000e+00> : vector<16x128xf32>
    %128 = tpu.matmul %33, %127, %cst_58 {dimension_numbers = #tpu.dot_dimension_numbers<[1], [0], [0], [1], [0, 0, 1, 1], [], []>} : vector<16x24xf32>, vector<24x128xf32>, vector<16x128xf32> -> vector<16x128xf32>
    %129 = vector.broadcast %34 : vector<16x1xf32> to vector<16x128xf32>
    %130 = arith.addf %128, %129 : vector<16x128xf32>
    %131 = vector.extract_strided_slice %130 {offsets = [0, 0], sizes = [8, 128], strides = [1, 1]} : vector<16x128xf32> to vector<8x128xf32>
    %cst_59 = arith.constant 0.000000e+00 : f32
    %132 = vector.broadcast %cst_59 : f32 to vector<8x128xf32>
    %133 = arith.subf %132, %131 : vector<8x128xf32>
    %134 = math.exp %133 : vector<8x128xf32>
    %cst_60 = arith.constant 1.000000e+00 : f32
    %135 = vector.broadcast %cst_60 : f32 to vector<8x128xf32>
    %136 = arith.addf %135, %134 : vector<8x128xf32>
    %cst_61 = arith.constant 1.000000e+00 : f32
    %137 = vector.broadcast %cst_61 : f32 to vector<8x128xf32>
    %138 = arith.divf %137, %136 : vector<8x128xf32>
    %139 = arith.mulf %131, %138 : vector<8x128xf32>
    %140 = vector.extract_strided_slice %130 {offsets = [8, 0], sizes = [8, 128], strides = [1, 1]} : vector<16x128xf32> to vector<8x128xf32>
    %c1_i32_62 = arith.constant 1 : i32
    %141 = tpu.dynamic_rotate %139 by %c1_i32_62 dim 1 : vector<8x128xf32>, i32 -> vector<8x128xf32>
    %142 = vector.broadcast %20 : vector<1x128xf32> to vector<8x128xf32>
    %143 = arith.mulf %141, %142 : vector<8x128xf32>
    %c127_i32_63 = arith.constant 127 : i32
    %144 = tpu.dynamic_rotate %139 by %c127_i32_63 dim 1 : vector<8x128xf32>, i32 -> vector<8x128xf32>
    %145 = vector.broadcast %24 : vector<1x128xf32> to vector<8x128xf32>
    %146 = arith.mulf %144, %145 : vector<8x128xf32>
    %147 = tpu.concatenate %143, %139, %146 in 0 : vector<8x128xf32>, vector<8x128xf32>, vector<8x128xf32> -> vector<24x128xf32>
    %cst_64 = arith.constant dense<0.000000e+00> : vector<8x128xf32>
    %148 = tpu.matmul %35, %147, %cst_64 {dimension_numbers = #tpu.dot_dimension_numbers<[1], [0], [0], [1], [0, 0, 1, 1], [], []>} : vector<8x24xf32>, vector<24x128xf32>, vector<8x128xf32> -> vector<8x128xf32>
    %149 = vector.broadcast %36 : vector<8x1xf32> to vector<8x128xf32>
    %150 = arith.addf %148, %149 : vector<8x128xf32>
    %cst_65 = arith.constant 0.000000e+00 : f32
    %151 = vector.broadcast %cst_65 : f32 to vector<8x128xf32>
    %152 = arith.subf %151, %150 : vector<8x128xf32>
    %153 = math.exp %152 : vector<8x128xf32>
    %cst_66 = arith.constant 1.000000e+00 : f32
    %154 = vector.broadcast %cst_66 : f32 to vector<8x128xf32>
    %155 = arith.addf %154, %153 : vector<8x128xf32>
    %cst_67 = arith.constant 1.000000e+00 : f32
    %156 = vector.broadcast %cst_67 : f32 to vector<8x128xf32>
    %157 = arith.divf %156, %155 : vector<8x128xf32>
    %158 = arith.mulf %150, %157 : vector<8x128xf32>
    %159 = arith.addf %158, %140 : vector<8x128xf32>
    %c1_i32_68 = arith.constant 1 : i32
    %160 = tpu.dynamic_rotate %159 by %c1_i32_68 dim 1 : vector<8x128xf32>, i32 -> vector<8x128xf32>
    %161 = vector.broadcast %20 : vector<1x128xf32> to vector<8x128xf32>
    %162 = arith.mulf %160, %161 : vector<8x128xf32>
    %c127_i32_69 = arith.constant 127 : i32
    %163 = tpu.dynamic_rotate %159 by %c127_i32_69 dim 1 : vector<8x128xf32>, i32 -> vector<8x128xf32>
    %164 = vector.broadcast %24 : vector<1x128xf32> to vector<8x128xf32>
    %165 = arith.mulf %163, %164 : vector<8x128xf32>
    %166 = tpu.concatenate %162, %159, %165 in 0 : vector<8x128xf32>, vector<8x128xf32>, vector<8x128xf32> -> vector<24x128xf32>
    %cst_70 = arith.constant dense<0.000000e+00> : vector<16x128xf32>
    %167 = tpu.matmul %29, %166, %cst_70 {dimension_numbers = #tpu.dot_dimension_numbers<[1], [0], [0], [1], [0, 0, 1, 1], [], []>} : vector<16x24xf32>, vector<24x128xf32>, vector<16x128xf32> -> vector<16x128xf32>
    %168 = vector.broadcast %30 : vector<16x1xf32> to vector<16x128xf32>
    %169 = arith.addf %167, %168 : vector<16x128xf32>
    %170 = vector.extract_strided_slice %169 {offsets = [0, 0], sizes = [8, 128], strides = [1, 1]} : vector<16x128xf32> to vector<8x128xf32>
    %cst_71 = arith.constant 0.000000e+00 : f32
    %171 = vector.broadcast %cst_71 : f32 to vector<8x128xf32>
    %172 = arith.subf %171, %170 : vector<8x128xf32>
    %173 = math.exp %172 : vector<8x128xf32>
    %cst_72 = arith.constant 1.000000e+00 : f32
    %174 = vector.broadcast %cst_72 : f32 to vector<8x128xf32>
    %175 = arith.addf %174, %173 : vector<8x128xf32>
    %cst_73 = arith.constant 1.000000e+00 : f32
    %176 = vector.broadcast %cst_73 : f32 to vector<8x128xf32>
    %177 = arith.divf %176, %175 : vector<8x128xf32>
    %178 = arith.mulf %170, %177 : vector<8x128xf32>
    %179 = vector.extract_strided_slice %169 {offsets = [8, 0], sizes = [8, 128], strides = [1, 1]} : vector<16x128xf32> to vector<8x128xf32>
    %c1_i32_74 = arith.constant 1 : i32
    %180 = tpu.dynamic_rotate %178 by %c1_i32_74 dim 1 : vector<8x128xf32>, i32 -> vector<8x128xf32>
    %181 = vector.broadcast %20 : vector<1x128xf32> to vector<8x128xf32>
    %182 = arith.mulf %180, %181 : vector<8x128xf32>
    %c127_i32_75 = arith.constant 127 : i32
    %183 = tpu.dynamic_rotate %178 by %c127_i32_75 dim 1 : vector<8x128xf32>, i32 -> vector<8x128xf32>
    %184 = vector.broadcast %24 : vector<1x128xf32> to vector<8x128xf32>
    %185 = arith.mulf %183, %184 : vector<8x128xf32>
    %186 = tpu.concatenate %182, %178, %185 in 0 : vector<8x128xf32>, vector<8x128xf32>, vector<8x128xf32> -> vector<24x128xf32>
    %cst_76 = arith.constant dense<0.000000e+00> : vector<8x128xf32>
    %187 = tpu.matmul %31, %186, %cst_76 {dimension_numbers = #tpu.dot_dimension_numbers<[1], [0], [0], [1], [0, 0, 1, 1], [], []>} : vector<8x24xf32>, vector<24x128xf32>, vector<8x128xf32> -> vector<8x128xf32>
    %188 = vector.broadcast %32 : vector<8x1xf32> to vector<8x128xf32>
    %189 = arith.addf %187, %188 : vector<8x128xf32>
    %cst_77 = arith.constant 0.000000e+00 : f32
    %190 = vector.broadcast %cst_77 : f32 to vector<8x128xf32>
    %191 = arith.subf %190, %189 : vector<8x128xf32>
    %192 = math.exp %191 : vector<8x128xf32>
    %cst_78 = arith.constant 1.000000e+00 : f32
    %193 = vector.broadcast %cst_78 : f32 to vector<8x128xf32>
    %194 = arith.addf %193, %192 : vector<8x128xf32>
    %cst_79 = arith.constant 1.000000e+00 : f32
    %195 = vector.broadcast %cst_79 : f32 to vector<8x128xf32>
    %196 = arith.divf %195, %194 : vector<8x128xf32>
    %197 = arith.mulf %189, %196 : vector<8x128xf32>
    %198 = arith.addf %197, %179 : vector<8x128xf32>
    %c1 = arith.constant 1 : index
    %c0_80 = arith.constant 0 : index
    %c0_81 = arith.constant 0 : index
    %199 = vector.load %arg14[%c1, %c0_80, %c0_81] : memref<3x8x128xf32, #tpu.memory_space<vmem>>, vector<1x8x128xf32>
    %200 = vector.shape_cast %199 : vector<1x8x128xf32> to vector<8x128xf32>
    %201 = vector.shape_cast %198 : vector<8x128xf32> to vector<1x8x128xf32>
    tpu.vector_store %arg14[%c1, %c0_80, %c0_81], %201 {strides = array<i32>} : memref<3x8x128xf32, #tpu.memory_space<vmem>>, vector<1x8x128xf32>,
    %c1_i32_82 = arith.constant 1 : i32
    %202 = tpu.dynamic_rotate %198 by %c1_i32_82 dim 1 : vector<8x128xf32>, i32 -> vector<8x128xf32>
    %203 = vector.broadcast %20 : vector<1x128xf32> to vector<8x128xf32>
    %204 = arith.mulf %202, %203 : vector<8x128xf32>
    %c127_i32_83 = arith.constant 127 : i32
    %205 = tpu.dynamic_rotate %198 by %c127_i32_83 dim 1 : vector<8x128xf32>, i32 -> vector<8x128xf32>
    %206 = vector.broadcast %24 : vector<1x128xf32> to vector<8x128xf32>
    %207 = arith.mulf %205, %206 : vector<8x128xf32>
    %208 = tpu.concatenate %204, %198, %207 in 0 : vector<8x128xf32>, vector<8x128xf32>, vector<8x128xf32> -> vector<24x128xf32>
    %cst_84 = arith.constant dense<0.000000e+00> : vector<16x128xf32>
    %209 = tpu.matmul %33, %208, %cst_84 {dimension_numbers = #tpu.dot_dimension_numbers<[1], [0], [0], [1], [0, 0, 1, 1], [], []>} : vector<16x24xf32>, vector<24x128xf32>, vector<16x128xf32> -> vector<16x128xf32>
    %210 = vector.broadcast %34 : vector<16x1xf32> to vector<16x128xf32>
    %211 = arith.addf %209, %210 : vector<16x128xf32>
    %212 = vector.extract_strided_slice %211 {offsets = [0, 0], sizes = [8, 128], strides = [1, 1]} : vector<16x128xf32> to vector<8x128xf32>
    %cst_85 = arith.constant 0.000000e+00 : f32
    %213 = vector.broadcast %cst_85 : f32 to vector<8x128xf32>
    %214 = arith.subf %213, %212 : vector<8x128xf32>
    %215 = math.exp %214 : vector<8x128xf32>
    %cst_86 = arith.constant 1.000000e+00 : f32
    %216 = vector.broadcast %cst_86 : f32 to vector<8x128xf32>
    %217 = arith.addf %216, %215 : vector<8x128xf32>
    %cst_87 = arith.constant 1.000000e+00 : f32
    %218 = vector.broadcast %cst_87 : f32 to vector<8x128xf32>
    %219 = arith.divf %218, %217 : vector<8x128xf32>
    %220 = arith.mulf %212, %219 : vector<8x128xf32>
    %221 = vector.extract_strided_slice %211 {offsets = [8, 0], sizes = [8, 128], strides = [1, 1]} : vector<16x128xf32> to vector<8x128xf32>
    %c1_i32_88 = arith.constant 1 : i32
    %222 = tpu.dynamic_rotate %220 by %c1_i32_88 dim 1 : vector<8x128xf32>, i32 -> vector<8x128xf32>
    %223 = vector.broadcast %20 : vector<1x128xf32> to vector<8x128xf32>
    %224 = arith.mulf %222, %223 : vector<8x128xf32>
    %c127_i32_89 = arith.constant 127 : i32
    %225 = tpu.dynamic_rotate %220 by %c127_i32_89 dim 1 : vector<8x128xf32>, i32 -> vector<8x128xf32>
    %226 = vector.broadcast %24 : vector<1x128xf32> to vector<8x128xf32>
    %227 = arith.mulf %225, %226 : vector<8x128xf32>
    %228 = tpu.concatenate %224, %220, %227 in 0 : vector<8x128xf32>, vector<8x128xf32>, vector<8x128xf32> -> vector<24x128xf32>
    %cst_90 = arith.constant dense<0.000000e+00> : vector<8x128xf32>
    %229 = tpu.matmul %35, %228, %cst_90 {dimension_numbers = #tpu.dot_dimension_numbers<[1], [0], [0], [1], [0, 0, 1, 1], [], []>} : vector<8x24xf32>, vector<24x128xf32>, vector<8x128xf32> -> vector<8x128xf32>
    %230 = vector.broadcast %36 : vector<8x1xf32> to vector<8x128xf32>
    %231 = arith.addf %229, %230 : vector<8x128xf32>
    %cst_91 = arith.constant 0.000000e+00 : f32
    %232 = vector.broadcast %cst_91 : f32 to vector<8x128xf32>
    %233 = arith.subf %232, %231 : vector<8x128xf32>
    %234 = math.exp %233 : vector<8x128xf32>
    %cst_92 = arith.constant 1.000000e+00 : f32
    %235 = vector.broadcast %cst_92 : f32 to vector<8x128xf32>
    %236 = arith.addf %235, %234 : vector<8x128xf32>
    %cst_93 = arith.constant 1.000000e+00 : f32
    %237 = vector.broadcast %cst_93 : f32 to vector<8x128xf32>
    %238 = arith.divf %237, %236 : vector<8x128xf32>
    %239 = arith.mulf %231, %238 : vector<8x128xf32>
    %240 = arith.addf %239, %221 : vector<8x128xf32>
    %c1_i32_94 = arith.constant 1 : i32
    %241 = tpu.dynamic_rotate %240 by %c1_i32_94 dim 1 : vector<8x128xf32>, i32 -> vector<8x128xf32>
    %242 = vector.broadcast %20 : vector<1x128xf32> to vector<8x128xf32>
    %243 = arith.mulf %241, %242 : vector<8x128xf32>
    %c127_i32_95 = arith.constant 127 : i32
    %244 = tpu.dynamic_rotate %240 by %c127_i32_95 dim 1 : vector<8x128xf32>, i32 -> vector<8x128xf32>
    %245 = vector.broadcast %24 : vector<1x128xf32> to vector<8x128xf32>
    %246 = arith.mulf %244, %245 : vector<8x128xf32>
    %247 = tpu.concatenate %243, %240, %246 in 0 : vector<8x128xf32>, vector<8x128xf32>, vector<8x128xf32> -> vector<24x128xf32>
    %cst_96 = arith.constant dense<0.000000e+00> : vector<16x128xf32>
    %248 = tpu.matmul %29, %247, %cst_96 {dimension_numbers = #tpu.dot_dimension_numbers<[1], [0], [0], [1], [0, 0, 1, 1], [], []>} : vector<16x24xf32>, vector<24x128xf32>, vector<16x128xf32> -> vector<16x128xf32>
    %249 = vector.broadcast %30 : vector<16x1xf32> to vector<16x128xf32>
    %250 = arith.addf %248, %249 : vector<16x128xf32>
    %251 = vector.extract_strided_slice %250 {offsets = [0, 0], sizes = [8, 128], strides = [1, 1]} : vector<16x128xf32> to vector<8x128xf32>
    %cst_97 = arith.constant 0.000000e+00 : f32
    %252 = vector.broadcast %cst_97 : f32 to vector<8x128xf32>
    %253 = arith.subf %252, %251 : vector<8x128xf32>
    %254 = math.exp %253 : vector<8x128xf32>
    %cst_98 = arith.constant 1.000000e+00 : f32
    %255 = vector.broadcast %cst_98 : f32 to vector<8x128xf32>
    %256 = arith.addf %255, %254 : vector<8x128xf32>
    %cst_99 = arith.constant 1.000000e+00 : f32
    %257 = vector.broadcast %cst_99 : f32 to vector<8x128xf32>
    %258 = arith.divf %257, %256 : vector<8x128xf32>
    %259 = arith.mulf %251, %258 : vector<8x128xf32>
    %260 = vector.extract_strided_slice %250 {offsets = [8, 0], sizes = [8, 128], strides = [1, 1]} : vector<16x128xf32> to vector<8x128xf32>
    %c1_i32_100 = arith.constant 1 : i32
    %261 = tpu.dynamic_rotate %259 by %c1_i32_100 dim 1 : vector<8x128xf32>, i32 -> vector<8x128xf32>
    %262 = vector.broadcast %20 : vector<1x128xf32> to vector<8x128xf32>
    %263 = arith.mulf %261, %262 : vector<8x128xf32>
    %c127_i32_101 = arith.constant 127 : i32
    %264 = tpu.dynamic_rotate %259 by %c127_i32_101 dim 1 : vector<8x128xf32>, i32 -> vector<8x128xf32>
    %265 = vector.broadcast %24 : vector<1x128xf32> to vector<8x128xf32>
    %266 = arith.mulf %264, %265 : vector<8x128xf32>
    %267 = tpu.concatenate %263, %259, %266 in 0 : vector<8x128xf32>, vector<8x128xf32>, vector<8x128xf32> -> vector<24x128xf32>
    %cst_102 = arith.constant dense<0.000000e+00> : vector<8x128xf32>
    %268 = tpu.matmul %31, %267, %cst_102 {dimension_numbers = #tpu.dot_dimension_numbers<[1], [0], [0], [1], [0, 0, 1, 1], [], []>} : vector<8x24xf32>, vector<24x128xf32>, vector<8x128xf32> -> vector<8x128xf32>
    %269 = vector.broadcast %32 : vector<8x1xf32> to vector<8x128xf32>
    %270 = arith.addf %268, %269 : vector<8x128xf32>
    %cst_103 = arith.constant 0.000000e+00 : f32
    %271 = vector.broadcast %cst_103 : f32 to vector<8x128xf32>
    %272 = arith.subf %271, %270 : vector<8x128xf32>
    %273 = math.exp %272 : vector<8x128xf32>
    %cst_104 = arith.constant 1.000000e+00 : f32
    %274 = vector.broadcast %cst_104 : f32 to vector<8x128xf32>
    %275 = arith.addf %274, %273 : vector<8x128xf32>
    %cst_105 = arith.constant 1.000000e+00 : f32
    %276 = vector.broadcast %cst_105 : f32 to vector<8x128xf32>
    %277 = arith.divf %276, %275 : vector<8x128xf32>
    %278 = arith.mulf %270, %277 : vector<8x128xf32>
    %279 = arith.addf %278, %260 : vector<8x128xf32>
    %c2 = arith.constant 2 : index
    %c0_106 = arith.constant 0 : index
    %c0_107 = arith.constant 0 : index
    %280 = vector.load %arg14[%c2, %c0_106, %c0_107] : memref<3x8x128xf32, #tpu.memory_space<vmem>>, vector<1x8x128xf32>
    %281 = vector.shape_cast %280 : vector<1x8x128xf32> to vector<8x128xf32>
    %282 = vector.shape_cast %279 : vector<8x128xf32> to vector<1x8x128xf32>
    tpu.vector_store %arg14[%c2, %c0_106, %c0_107], %282 {strides = array<i32>} : memref<3x8x128xf32, #tpu.memory_space<vmem>>, vector<1x8x128xf32>,
    return
  }
}

</mosaic_0001>

<bundles_post_ra>
// kernel: l63_darnn_forward.1
= control target key start
LH: loop header
LB: loop body
LE: loop exit
PB: predicated region body
PF: predicated region fallthrough
CT: control target
= control target key end

     0   :  { %vm104_vm0 = vcmask 195584   ;;  %v1484_v4 = vmov 0   ;;  %s1486_s21 = smov 127   ;;  %v47_v6 = vlaneseq  ;;  %v1487_v9 = vmov 0.0   ;;  %s1784_s0 = inlined_call_operand.vmem [shape: f32[8,128], index: 0, kind: input, shape index: {}]   ;;  %s1785_s1 = inlined_call_operand.vmem [shape: f32[8,128], index: 1, kind: input, shape index: {}]   ;;  %s1786_s2 = inlined_call_operand.vmem [shape: f32[16,24], index: 2, kind: input, shape index: {}]   ;;  %s1787_s3 = inlined_call_operand.vmem [shape: f32[16,1], index: 3, kind: input, shape index: {}]   ;;  %s1788_s5 = inlined_call_operand.vmem [shape: f32[8,1], index: 5, kind: input, shape index: {}]   ;;  %s1789_s7 = inlined_call_operand.vmem [shape: f32[16,1], index: 7, kind: input, shape index: {}]   ;;  %s1790_s4 = inlined_call_operand.vmem [shape: f32[8,24], index: 4, kind: input, shape index: {}]   ;;  %s1791_s6 = inlined_call_operand.vmem [shape: f32[16,24], index: 6, kind: input, shape index: {}]   ;;  %s1792_s9 = inlined_call_operand.vmem [shape: f32[8,1], index: 9, kind: input, shape index: {}]   ;;  %s1793_s8 = inlined_call_operand.vmem [shape: f32[8,24], index: 8, kind: input, shape index: {}]   ;;  %s1794_s10 = inlined_call_operand.vmem [shape: f32[16,24], index: 10, kind: input, shape index: {}]   ;;  %s1795_s14 = inlined_call_operand.vmem [shape: f32[3,8,128], index: 14, kind: output, shape index: {}]   ;;  %s1796_s11 = inlined_call_operand.vmem [shape: f32[16,1], index: 11, kind: input, shape index: {}]   ;;  %s1797_s13 = inlined_call_operand.vmem [shape: f32[8,1], index: 13, kind: input, shape index: {}]   ;;  %s1798_s12 = inlined_call_operand.vmem [shape: f32[8,24], index: 12, kind: input, shape index: {}]  }
   0x1   :  { %v85_v0 = vld [vmem:[%s1784_s0] sm:$0xff]  ;;  %1434 = vset.pattern.permute.xlu1 %v1484_v4  ;;  %1435 = vset.pattern.permute.xlu0 %v1484_v4  ;;  %s1485_s0 = smov 1   ;;  %v68_v17 = vld [vmem:[%s1786_s2 + $0x8] sm:$0xff]  ;;  %v1488_v26 = vmov 0.0|0.0   ;;  %vm1489_vm3 = vmmov 0  }
   0x2   :  { %v86_v1 = vld [vmem:[%s1785_s1] sm:$0xff]  ;;  %v48_v7 = vand.u32 127, %v47_v6  ;;  %1390 = vmatprep.subr.bf16.mxu1 %v1488_v26  ;;  %1293 = vmatprep.mubr.msk.f32.mxu1 %vm1489_vm3, %v1487_v9  ;;  %v70_v29 = vld [vmem:[%s1787_s3 + $0x8] sm:$0xff] }
   0x3   :  { %v67_v2 = vld [vmem:[%s1786_s2] sm:$0xff]  ;;  %v87_v3 = vmul.f32 %v86_v1, %v85_v0  ;;  %v1630_v57 = vld [vmem:[%s1791_s6 + $0x8] sm:$0xff] }
   0x4   :  { %1284 = vmatprep.mubr.msk.f32.mxu0 %vm104_vm0, %v67_v2  ;;  %v69_v5 = vld [vmem:[%s1787_s3] sm:$0xff]  ;;  %v53_v8 = vand.u32 15, %v48_v7  ;;  %v76_v4 = vld [vmem:[%s1789_s7 + $0x8] sm:$0xff] }
   0x5   :  { %96 = vperm.xlu1 %1434, %v69_v5   ;;  %88 = vrot.lane.b32.xlu0 %v87_v3, %s1485_s0  ;;  %v72_v30 = vld [vmem:[%s1788_s5] sm:$0xff] }
   0x6   :  { %vm61_vm1 = vcmp.ne.s32.totalorder %v53_v8, 0  ;;  %vm64_vm2 = vcmp.ne.s32.totalorder %v53_v8, 15  ;;  %v75_v31 = vld [vmem:[%s1789_s7] sm:$0xff] }
   0x7   :  { %v1581_v10 = vsel %vm61_vm1, 1.0, %v1487_v9  ;;  %v1585_v13 = vsel %vm64_vm2, 1.0, %v1487_v9  ;;  %v71_v37 = vld [vmem:[%s1790_s4] sm:$0xff] }
   0x8   :  { %v1619_v48 = vld [vmem:[%s1791_s6] sm:$0xff] }
   0x9   :  { %91 = vrot.lane.b32.xlu0 %v87_v3, %s1486_s21  ;;  %v78_v5 = vld [vmem:[%s1792_s9] sm:$0xff] }
  0x77   :  { %v89_v11 = vpop.permute.xlu0 %88 }
  0x78   :  { %v90_v12 = vmul.f32 %v1581_v10, %v89_v11 }
  0x7a   :  { %v1386_v14 = vpack.c.bf16 %v87_v3, %v90_v12 }
  0x7b   :  { %v92_v15 = vpop.permute.xlu0 %91 }
  0x7c   :  { %1387 = vmatprep.subr.bf16.mxu0 %v1386_v14  ;;  %v93_v16 = vmul.f32 %v1585_v13, %v92_v15 }
  0x7d   :  { %1389 = vmatpush3.bf16.msra.mxu0 %v1386_v14  ;;  %v1651_v14 = vld [vmem:[%s1793_s8] sm:$0xff] }
  0x7e   :  { %1282 = vmatprep.subr.mxu0 %v93_v16 }
  0x81   :  { %1283 = vmatpush3.msra.mxu0 %v93_v16 }
  0x82   :  { %1285 = vmatmul.mubr.msk.f32.vlgmr.msra.gmra.mrb[0].mxu0 %vm104_vm0, %v68_v17 }
  0x83   :  { %1302 = vmatprep.mubr.msk.f32.mxu0 %vm104_vm0, %v1619_v48 }
  0x84   :  { %v97_v18 = vpop.permute.xlu1 %96 }
 0x155   :  { %v1286_v19 = vpop.f32.mrb[0].mxu0 }
 0x156   :  { %v177_v20 = vpop.f32.mrb[1].mxu0 }
 0x157   :  { %v178_v21 = vadd.f32 %v177_v20, %v97_v18 }
 0x159   :  { %v186_v22 = vsub.f32 0.0, %v178_v21 }
 0x15b   :  { %v187_v23 = vmul.f32 1.442695, %v186_v22 }
 0x15d   :  { %1436 = vpow2.f32 %v187_v23 }
 0x167   :  { %v1437_v24 = vpop.eup %1436 }
 0x168   :  { %v189_v25 = vadd.f32 1.0, %v1437_v24 }
 0x16a   :  { %1438 = vrcp.f32 %v189_v25  ;;  %v1666_v25 = vld [vmem:[%s1794_s10] sm:$0xff] }
 0x174   :  { %v1439_v27 = vpop.eup %1438 }
 0x175   :  { %v192_v28 = vmul.f32 %v1439_v27, %v178_v21 }
 0x177   :  { %196 = vrot.lane.b32.xlu0 %v192_v28, %s1486_s21  ;;  %193 = vrot.lane.b32.xlu1 %v192_v28, %s1485_s0 }
 0x17b   :  { %101 = vperm.xlu0 %1435, %v70_v29   ;;  %201 = vperm.xlu1 %1434, %v72_v30   ;;  %v81_v30 = vld [vmem:[%s1796_s11] sm:$0xff] }
 0x17f   :  { %293 = vperm.xlu0 %1435, %v75_v31  }
 0x1e9   :  { %v194_v32 = vpop.permute.xlu1 %193  ;;  %v197_v35 = vpop.permute.xlu0 %196 }
 0x1ea   :  { %v195_v33 = vmul.f32 %v1581_v10, %v194_v32  ;;  %v198_v36 = vmul.f32 %v1585_v13, %v197_v35 }
 0x1ec   :  { %v1391_v34 = vpack.c.bf16 %v192_v28, %v195_v33 }
 0x1ee   :  { %1392 = vmatpush3.bf16.msra.mxu1 %v1391_v34 }
 0x1ef   :  { %1291 = vmatprep.subr.mxu1 %v1487_v9 }
 0x1f2   :  { %1292 = vmatpush3.msra.mxu1 %v198_v36  ;;  %v1684_v36 = vld [vmem:[%s1794_s10 + $0x8] sm:$0xff] }
 0x1f3   :  { %1294 = vmatmul.mubr.msk.f32.vlgmr.msra.gmra.mrb[0].mxu1 %vm104_vm0, %v71_v37  ;;  %1397 = vmatprep.subr.bf16.mxu1 %v1488_v26 }
 0x1f4   :  { %1311 = vmatprep.mubr.msk.f32.mxu1 %vm1489_vm3, %v1487_v9 }
 0x1fa   :  { %v202_v38 = vpop.permute.xlu1 %201  ;;  %v102_v46 = vpop.permute.xlu0 %101 }
 0x1fb   :  { %v183_v49 = vadd.f32 %v1286_v19, %v102_v46 }
 0x1fe   :  { %v1634_v59 = vpop.permute.xlu0 %293 }
 0x2c6   :  { %v273_v39 = vpop.f32.mrb[0].mxu1 }
 0x2c7   :  { %v274_v40 = vadd.f32 %v273_v39, %v202_v38  ;;  %v1295_v41 = vpop.f32.mrb[1].mxu1 }
 0x2c9   :  { %v277_v42 = vsub.f32 0.0, %v274_v40 }
 0x2cb   :  { %v278_v43 = vmul.f32 1.442695, %v277_v42 }
 0x2cd   :  { %1440 = vpow2.f32 %v278_v43 }
 0x2d7   :  { %v1441_v44 = vpop.eup %1440 }
 0x2d8   :  { %v280_v45 = vadd.f32 1.0, %v1441_v44 }
 0x2da   :  { %1442 = vrcp.f32 %v280_v45 }
 0x2e4   :  { %v1443_v47 = vpop.eup %1442 }
 0x2e5   :  { %v283_v50 = vmul.f32 %v1443_v47, %v274_v40  ;;  %v82_v47 = vld [vmem:[%s1796_s11 + $0x8] sm:$0xff] }
 0x2e7   :  { %v284_v51 = vadd.f32 %v283_v50, %v183_v49  ;;  %v84_v49 = vld [vmem:[%s1797_s13] sm:$0xff] }
 0x2e9   :  { %285 = vrot.lane.b32.xlu1 %v284_v51, %s1485_s0 }
 0x2ed   :  { %288 = vrot.lane.b32.xlu1 %v284_v51, %s1486_s21 }
 0x35b   :  { %v286_v52 = vpop.permute.xlu1 %285 }
 0x35c   :  { %v287_v53 = vmul.f32 %v1581_v10, %v286_v52 }
 0x35e   :  { %v1393_v54 = vpack.c.bf16 %v284_v51, %v287_v53 }
 0x35f   :  { %v289_v55 = vpop.permute.xlu1 %288 }
 0x360   :  { %v290_v56 = vmul.f32 %v1585_v13, %v289_v55  ;;  %1394 = vmatprep.subr.bf16.mxu0 %v1393_v54  ;;  %v1707_v55 = vld [vmem:[%s1798_s12] sm:$0xff] }
 0x361   :  { %1396 = vmatpush3.bf16.msra.mxu0 %v1393_v54 }
 0x362   :  { %1300 = vmatprep.subr.mxu0 %v290_v56 }
 0x365   :  { %1301 = vmatpush3.msra.mxu0 %v290_v56 }
 0x366   :  { %1303 = vmatmul.mubr.msk.f32.vlgmr.msra.gmra.mrb[2].mxu0 %vm104_vm0, %v1630_v57 }
 0x367   :  { %1320 = vmatprep.mubr.msk.f32.mxu0 %vm104_vm0, %v1666_v25 }
 0x439   :  { %v1304_v58 = vpop.f32.mrb[2].mxu0 }
 0x43a   :  { %v373_v60 = vpop.f32.mrb[3].mxu0 }
 0x43b   :  { %v374_v61 = vadd.f32 %v373_v60, %v1634_v59 }
 0x43d   :  { %v382_v62 = vsub.f32 0.0, %v374_v61 }
 0x43f   :  { %v383_v63 = vmul.f32 1.442695, %v382_v62 }
 0x441   :  { %1444 = vpow2.f32 %v383_v63 }
 0x44b   :  { %v1445_v0 = vpop.eup %1444 }
 0x44c   :  { %v385_v1 = vadd.f32 1.0, %v1445_v0 }
 0x44e   :  { %1446 = vrcp.f32 %v385_v1 }
 0x458   :  { %v1447_v2 = vpop.eup %1446 }
 0x459   :  { %v388_v3 = vmul.f32 %v1447_v2, %v374_v61 }
 0x45b   :  { %392 = vrot.lane.b32.xlu0 %v388_v3, %s1486_s21  ;;  %389 = vrot.lane.b32.xlu1 %v388_v3, %s1485_s0 }
 0x45f   :  { %298 = vperm.xlu0 %1435, %v76_v4   ;;  %397 = vperm.xlu1 %1434, %v78_v5  }
 0x4cd   :  { %v390_v6 = vpop.permute.xlu1 %389  ;;  %v393_v11 = vpop.permute.xlu0 %392 }
 0x4ce   :  { %v391_v7 = vmul.f32 %v1581_v10, %v390_v6  ;;  %v394_v12 = vmul.f32 %v1585_v13, %v393_v11 }
 0x4d0   :  { %v1398_v8 = vpack.c.bf16 %v388_v3, %v391_v7 }
 0x4d2   :  { %1399 = vmatpush3.bf16.msra.mxu1 %v1398_v8 }
 0x4d3   :  { %1309 = vmatprep.subr.mxu1 %v1487_v9 }
 0x4d6   :  { %1310 = vmatpush3.msra.mxu1 %v394_v12 }
 0x4d7   :  { %1312 = vmatmul.mubr.msk.f32.vlgmr.msra.gmra.mrb[2].mxu1 %vm104_vm0, %v1651_v14  ;;  %1404 = vmatprep.subr.bf16.mxu1 %v1488_v26 }
 0x4d8   :  { %1329 = vmatprep.mubr.msk.f32.mxu1 %vm1489_vm3, %v1487_v9 }
 0x4de   :  { %v1658_v15 = vpop.permute.xlu1 %397  ;;  %v1661_v23 = vpop.permute.xlu0 %298 }
 0x4df   :  { %v379_v27 = vadd.f32 %v1304_v58, %v1661_v23 }
 0x5aa   :  { %v469_v16 = vpop.f32.mrb[2].mxu1 }
 0x5ab   :  { %v470_v17 = vadd.f32 %v469_v16, %v1658_v15  ;;  %v1313_v18 = vpop.f32.mrb[3].mxu1 }
 0x5ad   :  { %v473_v19 = vsub.f32 0.0, %v470_v17 }
 0x5af   :  { %v474_v20 = vmul.f32 1.442695, %v473_v19 }
 0x5b1   :  { %1448 = vpow2.f32 %v474_v20 }
 0x5bb   :  { %v1449_v21 = vpop.eup %1448 }
 0x5bc   :  { %v476_v22 = vadd.f32 1.0, %v1449_v21 }
 0x5be   :  { %1450 = vrcp.f32 %v476_v22 }
 0x5c8   :  { %v1451_v24 = vpop.eup %1450 }
 0x5c9   :  { %v479_v28 = vmul.f32 %v1451_v24, %v470_v17 }
 0x5cb   :  { %v480_v29 = vadd.f32 %v479_v28, %v379_v27 }
 0x5cd   :  { %485 = vrot.lane.b32.xlu0 %v480_v29, %s1486_s21  ;;  %482 = vrot.lane.b32.xlu1 %v480_v29, %s1485_s0  ;;  %481 = vst [vmem:[%s1795_s14] sm:$0xff] %v480_v29 }
 0x5d1   :  { %490 = vperm.xlu1 %1434, %v81_v30  }
 0x63f   :  { %v483_v31 = vpop.permute.xlu1 %482  ;;  %v486_v33 = vpop.permute.xlu0 %485 }
 0x640   :  { %v484_v32 = vmul.f32 %v1581_v10, %v483_v31  ;;  %v487_v35 = vmul.f32 %v1585_v13, %v486_v33 }
 0x642   :  { %v1400_v34 = vpack.c.bf16 %v480_v29, %v484_v32 }
 0x644   :  { %1401 = vmatprep.subr.bf16.mxu0 %v1400_v34 }
 0x645   :  { %1403 = vmatpush3.bf16.msra.mxu0 %v1400_v34 }
 0x646   :  { %1318 = vmatprep.subr.mxu0 %v487_v35 }
 0x649   :  { %1319 = vmatpush3.msra.mxu0 %v487_v35 }
 0x64a   :  { %1321 = vmatmul.mubr.msk.f32.vlgmr.msra.gmra.mrb[4].mxu0 %vm104_vm0, %v1684_v36 }
 0x64b   :  { %1338 = vmatprep.mubr.msk.f32.mxu0 %vm104_vm0, %v1619_v48 }
 0x650   :  { %v1690_v38 = vpop.permute.xlu1 %490 }
 0x71d   :  { %v1322_v37 = vpop.f32.mrb[4].mxu0 }
 0x71e   :  { %v570_v39 = vpop.f32.mrb[5].mxu0 }
 0x71f   :  { %v571_v40 = vadd.f32 %v570_v39, %v1690_v38 }
 0x721   :  { %v579_v41 = vsub.f32 0.0, %v571_v40 }
 0x723   :  { %v580_v42 = vmul.f32 1.442695, %v579_v41 }
 0x725   :  { %1452 = vpow2.f32 %v580_v42 }
 0x72f   :  { %v1453_v43 = vpop.eup %1452 }
 0x730   :  { %v582_v44 = vadd.f32 1.0, %v1453_v43 }
 0x732   :  { %1454 = vrcp.f32 %v582_v44 }
 0x73c   :  { %v1455_v45 = vpop.eup %1454 }
 0x73d   :  { %v585_v46 = vmul.f32 %v1455_v45, %v571_v40 }
 0x73f   :  { %589 = vrot.lane.b32.xlu1 %v585_v46, %s1486_s21  ;;  %586 = vrot.lane.b32.xlu0 %v585_v46, %s1485_s0 }
 0x743   :  { %495 = vperm.xlu1 %1434, %v82_v47   ;;  %594 = vperm.xlu0 %1435, %v84_v49  }
 0x7b1   :  { %v587_v50 = vpop.permute.xlu0 %586  ;;  %v590_v53 = vpop.permute.xlu1 %589 }
 0x7b2   :  { %v588_v51 = vmul.f32 %v1581_v10, %v587_v50  ;;  %v591_v54 = vmul.f32 %v1585_v13, %v590_v53 }
 0x7b4   :  { %v1405_v52 = vpack.c.bf16 %v585_v46, %v588_v51 }
 0x7b6   :  { %1406 = vmatpush3.bf16.msra.mxu1 %v1405_v52 }
 0x7b7   :  { %1327 = vmatprep.subr.mxu1 %v1487_v9 }
 0x7ba   :  { %1328 = vmatpush3.msra.mxu1 %v591_v54 }
 0x7bb   :  { %1330 = vmatmul.mubr.msk.f32.vlgmr.msra.gmra.mrb[4].mxu1 %vm104_vm0, %v1707_v55  ;;  %1411 = vmatprep.subr.bf16.mxu1 %v1488_v26 }
 0x7bc   :  { %1347 = vmatprep.mubr.msk.f32.mxu1 %vm1489_vm3, %v1487_v9 }
 0x7c2   :  { %v1714_v56 = vpop.permute.xlu0 %594  ;;  %v1717_v2 = vpop.permute.xlu1 %495 }
 0x7c3   :  { %v576_v4 = vadd.f32 %v1322_v37, %v1717_v2 }
 0x88e   :  { %v666_v58 = vpop.f32.mrb[4].mxu1 }
 0x88f   :  { %v667_v60 = vadd.f32 %v666_v58, %v1714_v56  ;;  %v1331_v61 = vpop.f32.mrb[5].mxu1 }
 0x891   :  { %v670_v62 = vsub.f32 0.0, %v667_v60 }
 0x893   :  { %v671_v63 = vmul.f32 1.442695, %v670_v62 }
 0x895   :  { %1456 = vpow2.f32 %v671_v63 }
 0x89f   :  { %v1457_v0 = vpop.eup %1456 }
 0x8a0   :  { %v673_v1 = vadd.f32 1.0, %v1457_v0 }
 0x8a2   :  { %1458 = vrcp.f32 %v673_v1 }
 0x8ac   :  { %v1459_v3 = vpop.eup %1458 }
 0x8ad   :  { %v676_v5 = vmul.f32 %v1459_v3, %v667_v60 }
 0x8af   :  { %v677_v6 = vadd.f32 %v676_v5, %v576_v4 }
 0x8b1   :  { %681 = vrot.lane.b32.xlu1 %v677_v6, %s1486_s21  ;;  %678 = vrot.lane.b32.xlu0 %v677_v6, %s1485_s0 }
 0x923   :  { %v679_v7 = vpop.permute.xlu0 %678  ;;  %v682_v11 = vpop.permute.xlu1 %681 }
 0x924   :  { %v680_v8 = vmul.f32 %v1581_v10, %v679_v7  ;;  %v683_v16 = vmul.f32 %v1585_v13, %v682_v11 }
 0x926   :  { %v1407_v12 = vpack.c.bf16 %v677_v6, %v680_v8 }
 0x928   :  { %1408 = vmatprep.subr.bf16.mxu0 %v1407_v12 }
 0x929   :  { %1410 = vmatpush3.bf16.msra.mxu0 %v1407_v12 }
 0x92a   :  { %1336 = vmatprep.subr.mxu0 %v683_v16 }
 0x92d   :  { %1337 = vmatpush3.msra.mxu0 %v683_v16 }
 0x92e   :  { %1339 = vmatmul.mubr.msk.f32.vlgmr.msra.gmra.mrb[6].mxu0 %vm104_vm0, %v1630_v57 }
 0x92f   :  { %1356 = vmatprep.mubr.msk.f32.mxu0 %vm104_vm0, %v1666_v25 }
 0xa01   :  { %v1340_v17 = vpop.f32.mrb[6].mxu0 }
 0xa02   :  { %v750_v18 = vpop.f32.mrb[7].mxu0  ;;  %v756_v43 = vadd.f32 %v1340_v17, %v1661_v23 }
 0xa03   :  { %v751_v19 = vadd.f32 %v750_v18, %v1634_v59 }
 0xa05   :  { %v759_v20 = vsub.f32 0.0, %v751_v19 }
 0xa07   :  { %v760_v21 = vmul.f32 1.442695, %v759_v20 }
 0xa09   :  { %1460 = vpow2.f32 %v760_v21 }
 0xa13   :  { %v1461_v22 = vpop.eup %1460 }
 0xa14   :  { %v762_v24 = vadd.f32 1.0, %v1461_v22 }
 0xa16   :  { %1462 = vrcp.f32 %v762_v24 }
 0xa20   :  { %v1463_v27 = vpop.eup %1462 }
 0xa21   :  { %v765_v28 = vmul.f32 %v1463_v27, %v751_v19 }
 0xa23   :  { %769 = vrot.lane.b32.xlu1 %v765_v28, %s1486_s21  ;;  %766 = vrot.lane.b32.xlu0 %v765_v28, %s1485_s0 }
 0xa95   :  { %v767_v29 = vpop.permute.xlu0 %766  ;;  %v770_v31 = vpop.permute.xlu1 %769 }
 0xa96   :  { %v768_v30 = vmul.f32 %v1581_v10, %v767_v29  ;;  %v771_v32 = vmul.f32 %v1585_v13, %v770_v31 }
 0xa98   :  { %v1412_v25 = vpack.c.bf16 %v765_v28, %v768_v30 }
 0xa9a   :  { %1413 = vmatpush3.bf16.msra.mxu1 %v1412_v25 }
 0xa9b   :  { %1345 = vmatprep.subr.mxu1 %v1487_v9 }
 0xa9e   :  { %1346 = vmatpush3.msra.mxu1 %v771_v32 }
 0xa9f   :  { %1348 = vmatmul.mubr.msk.f32.vlgmr.msra.gmra.mrb[6].mxu1 %vm104_vm0, %v1651_v14  ;;  %1418 = vmatprep.subr.bf16.mxu1 %v1488_v26 }
 0xaa0   :  { %1365 = vmatprep.mubr.msk.f32.mxu1 %vm1489_vm3, %v1487_v9 }
 0xb72   :  { %v838_v33 = vpop.f32.mrb[6].mxu1 }
 0xb73   :  { %v839_v34 = vadd.f32 %v838_v33, %v1658_v15  ;;  %v1349_v35 = vpop.f32.mrb[7].mxu1 }
 0xb75   :  { %v842_v37 = vsub.f32 0.0, %v839_v34 }
 0xb77   :  { %v843_v39 = vmul.f32 1.442695, %v842_v37 }
 0xb79   :  { %1464 = vpow2.f32 %v843_v39 }
 0xb83   :  { %v1465_v40 = vpop.eup %1464 }
 0xb84   :  { %v845_v41 = vadd.f32 1.0, %v1465_v40 }
 0xb86   :  { %1466 = vrcp.f32 %v845_v41 }
 0xb90   :  { %v1467_v42 = vpop.eup %1466 }
 0xb91   :  { %v848_v44 = vmul.f32 %v1467_v42, %v839_v34 }
 0xb93   :  { %v849_v45 = vadd.f32 %v848_v44, %v756_v43 }
 0xb95   :  { %855 = vrot.lane.b32.xlu1 %v849_v45, %s1486_s21  ;;  %852 = vrot.lane.b32.xlu0 %v849_v45, %s1485_s0  ;;  %1216 = vst [vmem:[%s1795_s14 + $0x8] sm:$0xff] %v849_v45 }
 0xc07   :  { %v853_v46 = vpop.permute.xlu0 %852  ;;  %v856_v49 = vpop.permute.xlu1 %855 }
 0xc08   :  { %v854_v47 = vmul.f32 %v1581_v10, %v853_v46  ;;  %v857_v51 = vmul.f32 %v1585_v13, %v856_v49 }
 0xc0a   :  { %v1414_v50 = vpack.c.bf16 %v849_v45, %v854_v47 }
 0xc0c   :  { %1415 = vmatprep.subr.bf16.mxu0 %v1414_v50 }
 0xc0d   :  { %1417 = vmatpush3.bf16.msra.mxu0 %v1414_v50 }
 0xc0e   :  { %1354 = vmatprep.subr.mxu0 %v857_v51 }
 0xc11   :  { %1355 = vmatpush3.msra.mxu0 %v857_v51 }
 0xc12   :  { %1357 = vmatmul.mubr.msk.f32.vlgmr.msra.gmra.mrb[8].mxu0 %vm104_vm0, %v1684_v36 }
 0xc13   :  { %1374 = vmatprep.mubr.msk.f32.mxu0 %vm104_vm0, %v1619_v48 }
 0xce5   :  { %v1358_v52 = vpop.f32.mrb[8].mxu0 }
 0xce6   :  { %v924_v53 = vpop.f32.mrb[9].mxu0  ;;  %v930_v17 = vadd.f32 %v1358_v52, %v1717_v2 }
 0xce7   :  { %v925_v54 = vadd.f32 %v924_v53, %v1690_v38 }
 0xce9   :  { %v933_v58 = vsub.f32 0.0, %v925_v54 }
 0xceb   :  { %v934_v60 = vmul.f32 1.442695, %v933_v58 }
 0xced   :  { %1468 = vpow2.f32 %v934_v60 }
 0xcf7   :  { %v1469_v61 = vpop.eup %1468 }
 0xcf8   :  { %v936_v62 = vadd.f32 1.0, %v1469_v61 }
 0xcfa   :  { %1470 = vrcp.f32 %v936_v62 }
 0xd04   :  { %v1471_v63 = vpop.eup %1470 }
 0xd05   :  { %v939_v0 = vmul.f32 %v1471_v63, %v925_v54 }
 0xd07   :  { %943 = vrot.lane.b32.xlu1 %v939_v0, %s1486_s21  ;;  %940 = vrot.lane.b32.xlu0 %v939_v0, %s1485_s0 }
 0xd79   :  { %v941_v36 = vpop.permute.xlu0 %940  ;;  %v944_v3 = vpop.permute.xlu1 %943 }
 0xd7a   :  { %v942_v1 = vmul.f32 %v1581_v10, %v941_v36  ;;  %v945_v38 = vmul.f32 %v1585_v13, %v944_v3 }
 0xd7c   :  { %v1419_v48 = vpack.c.bf16 %v939_v0, %v942_v1 }
 0xd7e   :  { %1420 = vmatpush3.bf16.msra.mxu1 %v1419_v48 }
 0xd7f   :  { %1363 = vmatprep.subr.mxu1 %v1487_v9 }
 0xd82   :  { %1364 = vmatpush3.msra.mxu1 %v945_v38 }
 0xd83   :  { %1366 = vmatmul.mubr.msk.f32.vlgmr.msra.gmra.mrb[8].mxu1 %vm104_vm0, %v1707_v55  ;;  %1425 = vmatprep.subr.bf16.mxu1 %v1488_v26 }
 0xd84   :  { %1383 = vmatprep.mubr.msk.f32.mxu1 %vm1489_vm3, %v1487_v9 }
 0xe56   :  { %v1012_v4 = vpop.f32.mrb[8].mxu1 }
 0xe57   :  { %v1013_v5 = vadd.f32 %v1012_v4, %v1714_v56  ;;  %v1367_v6 = vpop.f32.mrb[9].mxu1 }
 0xe59   :  { %v1016_v7 = vsub.f32 0.0, %v1013_v5 }
 0xe5b   :  { %v1017_v8 = vmul.f32 1.442695, %v1016_v7 }
 0xe5d   :  { %1472 = vpow2.f32 %v1017_v8 }
 0xe67   :  { %v1473_v11 = vpop.eup %1472 }
 0xe68   :  { %v1019_v12 = vadd.f32 1.0, %v1473_v11 }
 0xe6a   :  { %1474 = vrcp.f32 %v1019_v12 }
 0xe74   :  { %v1475_v16 = vpop.eup %1474 }
 0xe75   :  { %v1022_v18 = vmul.f32 %v1475_v16, %v1013_v5 }
 0xe77   :  { %v1023_v55 = vadd.f32 %v1022_v18, %v930_v17 }
 0xe79   :  { %1027 = vrot.lane.b32.xlu1 %v1023_v55, %s1486_s21  ;;  %1024 = vrot.lane.b32.xlu0 %v1023_v55, %s1485_s0 }
 0xeeb   :  { %v1025_v26 = vpop.permute.xlu0 %1024  ;;  %v1028_v56 = vpop.permute.xlu1 %1027 }
 0xeec   :  { %v1026_v19 = vmul.f32 %v1581_v10, %v1025_v26  ;;  %v1029_v21 = vmul.f32 %v1585_v13, %v1028_v56 }
 0xeee   :  { %v1421_v20 = vpack.c.bf16 %v1023_v55, %v1026_v19 }
 0xef0   :  { %1422 = vmatprep.subr.bf16.mxu0 %v1421_v20 }
 0xef1   :  { %1424 = vmatpush3.bf16.msra.mxu0 %v1421_v20 }
 0xef2   :  { %1372 = vmatprep.subr.mxu0 %v1029_v21 }
 0xef5   :  { %1373 = vmatpush3.msra.mxu0 %v1029_v21 }
 0xef6   :  { %1375 = vmatmul.mubr.msk.f32.vlgmr.msra.gmra.mrb[10].mxu0 %vm104_vm0, %v1630_v57 }
 0xfc9   :  { %v1376_v2 = vpop.f32.mrb[10].mxu0 }
 0xfca   :  { %v1096_v22 = vpop.f32.mrb[11].mxu0  ;;  %v1102_v44 = vadd.f32 %v1376_v2, %v1661_v23 }
 0xfcb   :  { %v1097_v24 = vadd.f32 %v1096_v22, %v1634_v59 }
 0xfcd   :  { %v1105_v27 = vsub.f32 0.0, %v1097_v24 }
 0xfcf   :  { %v1106_v28 = vmul.f32 1.442695, %v1105_v27 }
 0xfd1   :  { %1476 = vpow2.f32 %v1106_v28 }
 0xfdb   :  { %v1477_v29 = vpop.eup %1476 }
 0xfdc   :  { %v1108_v30 = vadd.f32 1.0, %v1477_v29 }
 0xfde   :  { %1478 = vrcp.f32 %v1108_v30 }
 0xfe8   :  { %v1479_v25 = vpop.eup %1478 }
 0xfe9   :  { %v1111_v31 = vmul.f32 %v1479_v25, %v1097_v24 }
 0xfeb   :  { %1115 = vrot.lane.b32.xlu1 %v1111_v31, %s1486_s21  ;;  %1112 = vrot.lane.b32.xlu0 %v1111_v31, %s1485_s0 }
0x105d   :  { %v1113_v32 = vpop.permute.xlu0 %1112  ;;  %v1116_v34 = vpop.permute.xlu1 %1115 }
0x105e   :  { %v1114_v33 = vmul.f32 %v1581_v10, %v1113_v32  ;;  %v1117_v59 = vmul.f32 %v1585_v13, %v1116_v34 }
0x1060   :  { %v1426_v57 = vpack.c.bf16 %v1111_v31, %v1114_v33 }
0x1062   :  { %1427 = vmatpush3.bf16.msra.mxu1 %v1426_v57 }
0x1063   :  { %1381 = vmatprep.subr.mxu1 %v1487_v9 }
0x1066   :  { %1382 = vmatpush3.msra.mxu1 %v1117_v59 }
0x1067   :  { %1384 = vmatmul.mubr.msk.f32.vlgmr.msra.gmra.mrb[10].mxu1 %vm104_vm0, %v1651_v14 }
0x113a   :  { %v1184_v35 = vpop.f32.mrb[10].mxu1 }
0x113b   :  { %v1185_v37 = vadd.f32 %v1184_v35, %v1658_v15  ;;  %v1385_v39 = vpop.f32.mrb[11].mxu1 }
0x113d   :  { %v1188_v40 = vsub.f32 0.0, %v1185_v37 }
0x113f   :  { %v1189_v41 = vmul.f32 1.442695, %v1188_v40 }
0x1141   :  { %1480 = vpow2.f32 %v1189_v41 }
0x114b   :  { %v1481_v42 = vpop.eup %1480 }
0x114c   :  { %v1191_v10 = vadd.f32 1.0, %v1481_v42 }
0x114e   :  { %1482 = vrcp.f32 %v1191_v10 }
0x1158   :  { %v1483_v43 = vpop.eup %1482 }
0x1159   :  { %v1194_v9 = vmul.f32 %v1483_v43, %v1185_v37 }
0x115b   :  { %v1195_v45 = vadd.f32 %v1194_v9, %v1102_v44 }
0x115d   :  { %1223 = vst [vmem:[%s1795_s14 + $0x10] sm:$0xff] %v1195_v45 }

</bundles_post_ra>
